<compile_context>
chip_gen: v6e
topology: v6e:2x2x1
jax: 0.10.0
libtpu: 0.0.40
codegen_flags: <defaults>
</compile_context>

<pallas_src>
import jax
import jax.numpy as jnp
from jax.experimental import pallas as pl
from jax.experimental.pallas import tpu as pltpu


def _mlp_kernel(x_ref, w1_ref, b1_ref, w2_ref, b2_ref, w3_ref, b3_ref, o_ref):
    # fc1: bf16 operands on the MXU, f32 accumulation; bias/ReLU in f32.
    x = x_ref[...]
    if x.dtype != jnp.bfloat16:           # static (trace-time) dtype dispatch
        x = x.astype(jnp.bfloat16)        # cast fused with the load, no HBM pass
    h1 = jnp.dot(x, w1_ref[...], preferred_element_type=jnp.float32) + b1_ref[...]
    h1 = jnp.maximum(h1, 0.0)                                        # ReLU
    # dropout -> identity (eval mode)
    h2 = jnp.dot(h1.astype(jnp.bfloat16), w2_ref[...],
                 preferred_element_type=jnp.float32) + b2_ref[...]
    h2 = jnp.maximum(h2, 0.0)                                        # ReLU
    # dropout -> identity (eval mode)
    # fc3 has N=1: VPU multiply + cross-lane (XLU) reduce instead of a
    # 1-of-256-lanes MXU matmul -> removes one MXU push/pop from the chain.
    logits = jnp.sum(h2 * w3_ref[...], axis=-1, keepdims=True) + b3_ref[0, 0]
    # Stable sigmoid tail: clamp before exp so the approx EUP reciprocal never
    # sees inf (one VPU op, hides under DMA slack).
    logits = jnp.clip(logits, -30.0, 30.0)
    e = jnp.exp(-logits)                  # EUP
    o_ref[...] = pl.reciprocal(1.0 + e, approx=True)   # EUP slot, ~free


_MAX_TILE_B = 512   # review sweet spot (sweep 256/512/1024 if profiling)
_ALIGN = 16         # multiple of 16 sublanes -> valid for both f32 and bf16 x


def _round_up(v, m):
    return ((v + m - 1) // m) * m


def model_forward(x_nchw, params):
    """x_nchw: (B, C, H, W) float32 or bfloat16. Returns (B, 1) f32 probs."""
    w1, b1, w2, b2, w3, b3 = params
    B = x_nchw.shape[0]
    x_flat = x_nchw.reshape(B, -1)        # == nn.Flatten on NCHW (view-like)
    D = x_flat.shape[1]
    H = w1.shape[1]

    # bf16 for the two big weight matrices (bandwidth + MXU rate); the tiny
    # fc3 row / biases stay f32 on the VPU path.
    w1b = w1.astype(jnp.bfloat16)
    w2b = w2.astype(jnp.bfloat16)
    w3r = w3.reshape(1, H).astype(jnp.float32)
    b1r = b1.reshape(1, H).astype(jnp.float32)
    b2r = b2.reshape(1, H).astype(jnp.float32)
    b3s = b3.reshape(1, 1).astype(jnp.float32)           # scalar -> SMEM

    # Batch-tiled grid: big tiles amortize the ~0.35us per-grid-step overhead;
    # once B exceeds one tile, aim for >=2 grid steps so the "parallel" axis
    # can shard across v7x's two TensorCores.
    if B <= _ALIGN:
        tile_b = _ALIGN
    else:
        tile_b = min(_MAX_TILE_B, _round_up((B + 1) // 2, _ALIGN))
    n_tiles = (B + tile_b - 1) // tile_b
    b_pad = n_tiles * tile_b
    if b_pad != B:
        x_flat = jnp.pad(x_flat, ((0, b_pad - B), (0, 0)))

    # NOTE: w1/b1/w2/b2/w3 have constant index_maps (resident across the grid);
    # double-buffering them wastes <1 MiB of VMEM, which is not a constraint
    # at these tile sizes, so single-buffering is left as a future tweak.
    out = pl.pallas_call(
        _mlp_kernel,
        out_shape=jax.ShapeDtypeStruct((b_pad, 1), jnp.float32),
        grid=(n_tiles,),
        in_specs=[
            pl.BlockSpec((tile_b, D), lambda i: (i, 0)),        # x tile (pipelined)
            pl.BlockSpec((D, H), lambda i: (0, 0)),             # w1 (resident)
            pl.BlockSpec((1, H), lambda i: (0, 0)),             # b1
            pl.BlockSpec((H, H), lambda i: (0, 0)),             # w2 (resident)
            pl.BlockSpec((1, H), lambda i: (0, 0)),             # b2
            pl.BlockSpec((1, H), lambda i: (0, 0)),             # w3 row
            pl.BlockSpec(memory_space=pltpu.MemorySpace.SMEM),  # b3 scalar
        ],
        out_specs=pl.BlockSpec((tile_b, 1), lambda i: (i, 0)),
        compiler_params=pltpu.CompilerParams(
            dimension_semantics=("parallel",),
            vmem_limit_bytes=32 * 1024 * 1024),
    )(x_flat, w1b, b1r, w2b, b2r, w3r, b3s)
    return out[:B]


def init_params(key, in_features, hidden=256):
    """Deterministic synthetic init (shapes match nn.Linear layers)."""
    ks = jax.random.split(key, 6)
    s1 = 1.0 / jnp.sqrt(in_features)
    s2 = 1.0 / jnp.sqrt(hidden)
    w1 = jax.random.uniform(ks[0], (in_features, hidden), jnp.float32, -s1, s1)
    b1 = jax.random.uniform(ks[1], (1, hidden), jnp.float32, -s1, s1)
    w2 = jax.random.uniform(ks[2], (hidden, hidden), jnp.float32, -s2, s2)
    b2 = jax.random.uniform(ks[3], (1, hidden), jnp.float32, -s2, s2)
    w3 = jax.random.uniform(ks[4], (1, hidden), jnp.float32, -s2, s2)   # fc3 row
    b3 = jax.random.uniform(ks[5], (1, 1), jnp.float32, -s2, s2)
    return (w1, b1, w2, b2, w3, b3)


if __name__ == "__main__":
    # Small shapes consistent with the module: cols=16, rows=16, channels=4
    B, C, H, W = 2, 4, 16, 16
    key = jax.random.PRNGKey(0)
    k_x, k_p = jax.random.split(key)

    x = jax.random.normal(k_x, (B, C, H, W), jnp.float32)
    params = init_params(k_p, C * H * W)

    # Producer emits bf16 activations (review: halves the dominant x DMA).
    # In a real pipeline this cast is fused into the upstream op; it is done
    # here only because the demo input is synthesized in f32.
    x_bf16 = x.astype(jnp.bfloat16)

    fwd = jax.jit(model_forward)
    out = fwd(x_bf16, params)
    out = jax.block_until_ready(out)

    # Reference in plain JAX with identical bf16 casts of the matmul operands.
    w1, b1, w2, b2, w3, b3 = params
    bf16 = jnp.bfloat16
    xf = x_bf16.reshape(B, -1)
    h1 = jnp.maximum(jnp.dot(xf, w1.astype(bf16),
                             preferred_element_type=jnp.float32) + b1, 0.0)
    h2 = jnp.maximum(jnp.dot(h1.astype(bf16), w2.astype(bf16),
                             preferred_element_type=jnp.float32) + b2, 0.0)
    logits = jnp.sum(h2 * w3, axis=-1, keepdims=True) + b3
    ref = jax.nn.sigmoid(logits)

    assert out.shape == (B, 1)
    assert jnp.allclose(out, ref, atol=2e-3, rtol=2e-3)

    print("KERNEL_OK")
</pallas_src>

<mosaic_0001>
module attributes {stable_mosaic.version = 11 : i64} {
  func.func @_mlp_kernel(%arg0: i32, %arg1: memref<16x1024xbf16, #tpu.memory_space<vmem>>, %arg2: memref<1024x256xbf16, #tpu.memory_space<vmem>>, %arg3: memref<1x256xf32, #tpu.memory_space<vmem>>, %arg4: memref<256x256xbf16, #tpu.memory_space<vmem>>, %arg5: memref<1x256xf32, #tpu.memory_space<vmem>>, %arg6: memref<1x256xf32, #tpu.memory_space<vmem>>, %arg7: memref<1x1xf32, #tpu.memory_space<smem>>, %arg8: memref<16x1xf32, #tpu.memory_space<vmem>>) attributes {dimension_semantics = [#tpu.dimension_semantics<parallel>], iteration_bounds = array<i64: 1>, scalar_prefetch = 0 : i64, scratch_operands = 0 : i64, tpu.core_type = #tpu.core_type<tc>, window_params = [{transform_indices = @transform_0, window_bounds = array<i64: 16, 1024>}, {pipeline_mode = #tpu.pipeline_mode<synchronous>, transform_indices = @transform_1, window_bounds = array<i64: 1024, 256>}, {pipeline_mode = #tpu.pipeline_mode<synchronous>, transform_indices = @transform_2, window_bounds = array<i64: 1, 256>}, {pipeline_mode = #tpu.pipeline_mode<synchronous>, transform_indices = @transform_3, window_bounds = array<i64: 256, 256>}, {pipeline_mode = #tpu.pipeline_mode<synchronous>, transform_indices = @transform_4, window_bounds = array<i64: 1, 256>}, {pipeline_mode = #tpu.pipeline_mode<synchronous>, transform_indices = @transform_5, window_bounds = array<i64: 1, 256>}, {transform_indices = @transform_6, window_bounds = array<i64: 1, 1>}, {transform_indices = @transform_7, window_bounds = array<i64: 16, 1>}]} {
    %c0 = arith.constant 0 : index
    %c0_0 = arith.constant 0 : index
    %0 = vector.load %arg1[%c0, %c0_0] : memref<16x1024xbf16, #tpu.memory_space<vmem>>, vector<16x1024xbf16>
    %c0_1 = arith.constant 0 : index
    %c0_2 = arith.constant 0 : index
    %1 = vector.load %arg2[%c0_1, %c0_2] : memref<1024x256xbf16, #tpu.memory_space<vmem>>, vector<1024x256xbf16>
    %cst = arith.constant dense<0.000000e+00> : vector<16x256xf32>
    %2 = tpu.matmul %0, %1, %cst {dimension_numbers = #tpu.dot_dimension_numbers<[1], [0], [0], [1], [0, 0, 1, 1], [], []>} : vector<16x1024xbf16>, vector<1024x256xbf16>, vector<16x256xf32> -> vector<16x256xf32>
    %c0_3 = arith.constant 0 : index
    %c0_4 = arith.constant 0 : index
    %3 = vector.load %arg3[%c0_3, %c0_4] : memref<1x256xf32, #tpu.memory_space<vmem>>, vector<1x256xf32>
    %4 = vector.broadcast %3 : vector<1x256xf32> to vector<16x256xf32>
    %5 = arith.addf %2, %4 : vector<16x256xf32>
    %cst_5 = arith.constant 0.000000e+00 : f32
    %6 = vector.broadcast %cst_5 : f32 to vector<16x256xf32>
    %7 = arith.maximumf %5, %6 : vector<16x256xf32>
    %8 = arith.truncf %7 : vector<16x256xf32> to vector<16x256xbf16>
    %c0_6 = arith.constant 0 : index
    %c0_7 = arith.constant 0 : index
    %9 = vector.load %arg4[%c0_6, %c0_7] : memref<256x256xbf16, #tpu.memory_space<vmem>>, vector<256x256xbf16>
    %cst_8 = arith.constant dense<0.000000e+00> : vector<16x256xf32>
    %10 = tpu.matmul %8, %9, %cst_8 {dimension_numbers = #tpu.dot_dimension_numbers<[1], [0], [0], [1], [0, 0, 1, 1], [], []>} : vector<16x256xbf16>, vector<256x256xbf16>, vector<16x256xf32> -> vector<16x256xf32>
    %c0_9 = arith.constant 0 : index
    %c0_10 = arith.constant 0 : index
    %11 = vector.load %arg5[%c0_9, %c0_10] : memref<1x256xf32, #tpu.memory_space<vmem>>, vector<1x256xf32>
    %12 = vector.broadcast %11 : vector<1x256xf32> to vector<16x256xf32>
    %13 = arith.addf %10, %12 : vector<16x256xf32>
    %cst_11 = arith.constant 0.000000e+00 : f32
    %14 = vector.broadcast %cst_11 : f32 to vector<16x256xf32>
    %15 = arith.maximumf %13, %14 : vector<16x256xf32>
    %c0_12 = arith.constant 0 : index
    %c0_13 = arith.constant 0 : index
    %16 = vector.load %arg6[%c0_12, %c0_13] : memref<1x256xf32, #tpu.memory_space<vmem>>, vector<1x256xf32>
    %17 = vector.broadcast %16 : vector<1x256xf32> to vector<16x256xf32>
    %18 = arith.mulf %15, %17 : vector<16x256xf32>
    %cst_14 = arith.constant dense<0.000000e+00> : vector<16xf32>
    %19 = vector.multi_reduction <add>, %18, %cst_14 [1] : vector<16x256xf32> to vector<16xf32>
    %20 = vector.shape_cast %19 : vector<16xf32> to vector<16x1xf32>
    %c0_15 = arith.constant 0 : index
    %c0_16 = arith.constant 0 : index
    %21 = memref.load %arg7[%c0_15, %c0_16] : memref<1x1xf32, #tpu.memory_space<smem>>
    %22 = vector.broadcast %21 : f32 to vector<16x1xf32>
    %23 = arith.addf %20, %22 : vector<16x1xf32>
    %cst_17 = arith.constant -3.000000e+01 : f32
    %cst_18 = arith.constant 3.000000e+01 : f32
    %24 = vector.broadcast %cst_17 : f32 to vector<16x1xf32>
    %25 = arith.maximumf %24, %23 : vector<16x1xf32>
    %26 = vector.broadcast %cst_18 : f32 to vector<16x1xf32>
    %27 = arith.minimumf %26, %25 : vector<16x1xf32>
    %cst_19 = arith.constant 0.000000e+00 : f32
    %28 = vector.broadcast %cst_19 : f32 to vector<16x1xf32>
    %29 = arith.subf %28, %27 : vector<16x1xf32>
    %30 = math.exp %29 : vector<16x1xf32>
    %cst_20 = arith.constant 1.000000e+00 : f32
    %31 = vector.broadcast %cst_20 : f32 to vector<16x1xf32>
    %32 = arith.addf %31, %30 : vector<16x1xf32>
    %33 = tpu.reciprocal %32 {approx = true} : vector<16x1xf32> -> vector<16x1xf32>
    %c0_21 = arith.constant 0 : index
    %c0_22 = arith.constant 0 : index
    %34 = vector.load %arg8[%c0_21, %c0_22] : memref<16x1xf32, #tpu.memory_space<vmem>>, vector<16x1xf32>
    tpu.vector_store %arg8[%c0_21, %c0_22], %33 {strides = array<i32>} : memref<16x1xf32, #tpu.memory_space<vmem>>, vector<16x1xf32>,
    return
  }
  func.func @transform_0(%arg0: i32) -> (i32, i32) {
    %c0_i32 = arith.constant 0 : i32
    %c0_i32_0 = arith.constant 0 : i32
    return %arg0, %c0_i32 : i32, i32
  }
  func.func @transform_1(%arg0: i32) -> (i32, i32) {
    %c0_i32 = arith.constant 0 : i32
    %c0_i32_0 = arith.constant 0 : i32
    %c0_i32_1 = arith.constant 0 : i32
    return %c0_i32, %c0_i32_0 : i32, i32
  }
  func.func @transform_2(%arg0: i32) -> (i32, i32) {
    %c0_i32 = arith.constant 0 : i32
    %c0_i32_0 = arith.constant 0 : i32
    %c0_i32_1 = arith.constant 0 : i32
    return %c0_i32, %c0_i32_0 : i32, i32
  }
  func.func @transform_3(%arg0: i32) -> (i32, i32) {
    %c0_i32 = arith.constant 0 : i32
    %c0_i32_0 = arith.constant 0 : i32
    %c0_i32_1 = arith.constant 0 : i32
    return %c0_i32, %c0_i32_0 : i32, i32
  }
  func.func @transform_4(%arg0: i32) -> (i32, i32) {
    %c0_i32 = arith.constant 0 : i32
    %c0_i32_0 = arith.constant 0 : i32
    %c0_i32_1 = arith.constant 0 : i32
    return %c0_i32, %c0_i32_0 : i32, i32
  }
  func.func @transform_5(%arg0: i32) -> (i32, i32) {
    %c0_i32 = arith.constant 0 : i32
    %c0_i32_0 = arith.constant 0 : i32
    %c0_i32_1 = arith.constant 0 : i32
    return %c0_i32, %c0_i32_0 : i32, i32
  }
  func.func @transform_6(%arg0: i32) -> (i32, i32) {
    %c0_i32 = arith.constant 0 : i32
    %c0_i32_0 = arith.constant 0 : i32
    %c0_i32_1 = arith.constant 0 : i32
    return %c0_i32, %c0_i32_0 : i32, i32
  }
  func.func @transform_7(%arg0: i32) -> (i32, i32) {
    %c0_i32 = arith.constant 0 : i32
    %c0_i32_0 = arith.constant 0 : i32
    return %arg0, %c0_i32 : i32, i32
  }
}

</mosaic_0001>

<bundles_post_ra>
// kernel: model_forward.1
= control target key start
LH: loop header
LB: loop body
LE: loop exit
PB: predicated region body
PF: predicated region fallthrough
CT: control target
= control target key end

     0   :  { %vm1324_vm0 = vcmask 7168   ;;  %s2327_s1 = inlined_call_operand.vmem [shape: bf16[1024,256], index: 1, kind: input, shape index: {}]   ;;  %s2328_s0 = inlined_call_operand.vmem [shape: bf16[16,1024], index: 0, kind: input, shape index: {}]   ;;  %s2329_s3 = inlined_call_operand.vmem [shape: bf16[256,256], index: 3, kind: input, shape index: {}]   ;;  %s2330_s2 = inlined_call_operand.vmem [shape: f32[1,256], index: 2, kind: input, shape index: {}]   ;;  %s2331_s4 = inlined_call_operand.vmem [shape: f32[1,256], index: 4, kind: input, shape index: {}]   ;;  %s2332_s5 = inlined_call_operand.vmem [shape: f32[1,256], index: 5, kind: input, shape index: {}]   ;;  %s2333_s6 = inlined_call_operand.<no memory space> [shape: f32[1,1], index: 6, kind: input, shape index: {}]   ;;  %s2334_s7 = inlined_call_operand.vmem [shape: f32[16,1], index: 7, kind: output, shape index: {}]  }
   0x1   :  { %v1501_v0 = vld [vmem:[%s2327_s1 + $0x74] ss:$8 sps:$4 sm:$0xff]   ;;  %v1505_v2 = vld [vmem:[%s2327_s1 + $0x70] ss:$8 sps:$4 sm:$0xff]   ;;  %v1507_v4 = vld [vmem:[%s2327_s1 + $0x64] ss:$8 sps:$4 sm:$0xff]  }
   0x2   :  { %v1503_v1 = vld [vmem:[%s2327_s1 + $0x174] ss:$8 sps:$4 sm:$0xff]   ;;  %855 = vmatprep.subr.bf16.mxu0 %v1501_v0  ;;  %v1506_v3 = vld [vmem:[%s2327_s1 + $0x170] ss:$8 sps:$4 sm:$0xff]   ;;  %v1509_v5 = vld [vmem:[%s2327_s1 + $0x164] ss:$8 sps:$4 sm:$0xff]  }
   0x3   :  { %898 = vmatprep.subr.bf16.mxu1 %v1503_v1  ;;  %856 = vmatpush1.bf16.msra.mxu0 %v1505_v2  ;;  %v1511_v6 = vld [vmem:[%s2327_s1 + $0x60] ss:$8 sps:$4 sm:$0xff]   ;;  %v1513_v8 = vld [vmem:[%s2327_s1 + $0x54] ss:$8 sps:$4 sm:$0xff]   ;;  %v1517_v10 = vld [vmem:[%s2327_s1 + $0x50] ss:$8 sps:$4 sm:$0xff]  }
   0x4   :  { %899 = vmatpush1.bf16.msra.mxu1 %v1506_v3  ;;  %857 = vmatprep.subr.bf16.mxu0 %v1507_v4  ;;  %v1512_v7 = vld [vmem:[%s2327_s1 + $0x160] ss:$8 sps:$4 sm:$0xff]   ;;  %v1515_v9 = vld [vmem:[%s2327_s1 + $0x154] ss:$8 sps:$4 sm:$0xff]   ;;  %v1518_v11 = vld [vmem:[%s2327_s1 + $0x150] ss:$8 sps:$4 sm:$0xff]  }
   0x5   :  { %900 = vmatprep.subr.bf16.mxu1 %v1509_v5  ;;  %v1519_v12 = vld [vmem:[%s2327_s1 + $0x44] ss:$8 sps:$4 sm:$0xff]   ;;  %v1523_v14 = vld [vmem:[%s2327_s1 + $0x40] ss:$8 sps:$4 sm:$0xff]   ;;  %v1525_v16 = vld [vmem:[%s2327_s1 + $0x34] ss:$8 sps:$4 sm:$0xff]  }
   0x6   :  { %v1521_v13 = vld [vmem:[%s2327_s1 + $0x144] ss:$8 sps:$4 sm:$0xff]   ;;  %v1524_v15 = vld [vmem:[%s2327_s1 + $0x140] ss:$8 sps:$4 sm:$0xff]   ;;  %v1527_v17 = vld [vmem:[%s2327_s1 + $0x134] ss:$8 sps:$4 sm:$0xff]  }
   0x7   :  { %858 = vmatpush1.bf16.msra.mxu0 %v1511_v6  ;;  %v1529_v18 = vld [vmem:[%s2327_s1 + $0x30] ss:$8 sps:$4 sm:$0xff]   ;;  %v1531_v20 = vld [vmem:[%s2327_s1 + $0x24] ss:$8 sps:$4 sm:$0xff]   ;;  %v1535_v22 = vld [vmem:[%s2327_s1 + $0x20] ss:$8 sps:$4 sm:$0xff]  }
   0x8   :  { %901 = vmatpush1.bf16.msra.mxu1 %v1512_v7  ;;  %859 = vmatprep.subr.bf16.mxu0 %v1513_v8  ;;  %v1530_v19 = vld [vmem:[%s2327_s1 + $0x130] ss:$8 sps:$4 sm:$0xff]   ;;  %v1533_v21 = vld [vmem:[%s2327_s1 + $0x124] ss:$8 sps:$4 sm:$0xff]   ;;  %v1536_v23 = vld [vmem:[%s2327_s1 + $0x120] ss:$8 sps:$4 sm:$0xff]  }
   0x9   :  { %902 = vmatprep.subr.bf16.mxu1 %v1515_v9  ;;  %v1537_v24 = vld [vmem:[%s2327_s1 + $0x14] ss:$8 sps:$4 sm:$0xff]   ;;  %v1541_v26 = vld [vmem:[%s2327_s1 + $0x10] ss:$8 sps:$4 sm:$0xff]   ;;  %v1543_v28 = vld [vmem:[%s2327_s1 + $0x4] ss:$8 sps:$4 sm:$0xff]  }
   0xa   :  { %v1539_v25 = vld [vmem:[%s2327_s1 + $0x114] ss:$8 sps:$4 sm:$0xff]   ;;  %v1542_v27 = vld [vmem:[%s2327_s1 + $0x110] ss:$8 sps:$4 sm:$0xff]   ;;  %v1545_v29 = vld [vmem:[%s2327_s1 + $0x104] ss:$8 sps:$4 sm:$0xff]  }
   0xb   :  { %860 = vmatpush1.bf16.msra.mxu0 %v1517_v10  ;;  %v1547_v30 = vld [vmem:[%s2327_s1] ss:$8 sps:$4 sm:$0xff]   ;;  %v1549_v32 = vld [vmem:[%s2327_s1 + $0xf4] ss:$8 sps:$4 sm:$0xff]   ;;  %v1553_v34 = vld [vmem:[%s2327_s1 + $0xf0] ss:$8 sps:$4 sm:$0xff]  }
   0xc   :  { %903 = vmatpush1.bf16.msra.mxu1 %v1518_v11  ;;  %861 = vmatprep.subr.bf16.mxu0 %v1519_v12  ;;  %v1548_v31 = vld [vmem:[%s2327_s1 + $0x100] ss:$8 sps:$4 sm:$0xff]   ;;  %v1551_v33 = vld [vmem:[%s2327_s1 + $0x1f4] ss:$8 sps:$4 sm:$0xff]   ;;  %v1554_v35 = vld [vmem:[%s2327_s1 + $0x1f0] ss:$8 sps:$4 sm:$0xff]  }
   0xd   :  { %904 = vmatprep.subr.bf16.mxu1 %v1521_v13  ;;  %v1555_v36 = vld [vmem:[%s2327_s1 + $0xe4] ss:$8 sps:$4 sm:$0xff]   ;;  %v1559_v38 = vld [vmem:[%s2327_s1 + $0xe0] ss:$8 sps:$4 sm:$0xff]   ;;  %v1561_v40 = vld [vmem:[%s2327_s1 + $0xd4] ss:$8 sps:$4 sm:$0xff]  }
   0xe   :  { %v1557_v37 = vld [vmem:[%s2327_s1 + $0x1e4] ss:$8 sps:$4 sm:$0xff]   ;;  %v1560_v39 = vld [vmem:[%s2327_s1 + $0x1e0] ss:$8 sps:$4 sm:$0xff]   ;;  %v1563_v41 = vld [vmem:[%s2327_s1 + $0x1d4] ss:$8 sps:$4 sm:$0xff]  }
   0xf   :  { %862 = vmatpush1.bf16.msra.mxu0 %v1523_v14  ;;  %v1565_v42 = vld [vmem:[%s2327_s1 + $0xd0] ss:$8 sps:$4 sm:$0xff]   ;;  %v1567_v44 = vld [vmem:[%s2327_s1 + $0xc4] ss:$8 sps:$4 sm:$0xff]   ;;  %v1571_v46 = vld [vmem:[%s2327_s1 + $0xc0] ss:$8 sps:$4 sm:$0xff]  }
  0x10   :  { %905 = vmatpush1.bf16.msra.mxu1 %v1524_v15  ;;  %863 = vmatprep.subr.bf16.mxu0 %v1525_v16  ;;  %v1566_v43 = vld [vmem:[%s2327_s1 + $0x1d0] ss:$8 sps:$4 sm:$0xff]   ;;  %v1569_v45 = vld [vmem:[%s2327_s1 + $0x1c4] ss:$8 sps:$4 sm:$0xff]   ;;  %v1572_v47 = vld [vmem:[%s2327_s1 + $0x1c0] ss:$8 sps:$4 sm:$0xff]  }
  0x11   :  { %906 = vmatprep.subr.bf16.mxu1 %v1527_v17  ;;  %v27_v48 = vld [vmem:[%s2328_s0] sm:$0xff]  ;;  %v28_v50 = vld [vmem:[%s2328_s0 + $0x8] sm:$0xff]  ;;  %v1573_v52 = vld [vmem:[%s2327_s1 + $0xb4] ss:$8 sps:$4 sm:$0xff]  }
  0x12   :  { %v31_v49 = vld [vmem:[%s2328_s0 + $0x20] sm:$0xff]  ;;  %v32_v51 = vld [vmem:[%s2328_s0 + $0x28] sm:$0xff]  ;;  %v1575_v54 = vld [vmem:[%s2327_s1 + $0x1b4] ss:$8 sps:$4 sm:$0xff]  }
  0x13   :  { %864 = vmatpush1.bf16.msra.mxu0 %v1529_v18  ;;  %v1332_v53 = vcombine.high %v27_v48, %v31_v49  ;;  %v1334_v55 = vcombine.high %v28_v50, %v32_v51  ;;  %v1577_v56 = vld [vmem:[%s2327_s1 + $0xb0] ss:$8 sps:$4 sm:$0xff]   ;;  %v1579_v58 = vld [vmem:[%s2327_s1 + $0xa4] ss:$8 sps:$4 sm:$0xff]   ;;  %v1583_v60 = vld [vmem:[%s2327_s1 + $0xa0] ss:$8 sps:$4 sm:$0xff]   ;;  %v1331_v8 = vcombine.low %v27_v48, %v31_v49  ;;  %v1333_v9 = vcombine.low %v28_v50, %v32_v51 }
  0x14   :  { %907 = vmatpush1.bf16.msra.mxu1 %v1530_v19  ;;  %865 = vmatprep.subr.bf16.mxu0 %v1531_v20  ;;  %v1578_v57 = vld [vmem:[%s2327_s1 + $0x1b0] ss:$8 sps:$4 sm:$0xff]   ;;  %v1581_v59 = vld [vmem:[%s2327_s1 + $0x1a4] ss:$8 sps:$4 sm:$0xff]   ;;  %v1584_v61 = vld [vmem:[%s2327_s1 + $0x1a0] ss:$8 sps:$4 sm:$0xff]  }
  0x15   :  { %908 = vmatprep.subr.bf16.mxu1 %v1533_v21  ;;  %887 = vmatprep.mubr.bf16.mxu0 %v1332_v53  ;;  %v1585_v62 = vld [vmem:[%s2327_s1 + $0x94] ss:$8 sps:$4 sm:$0xff]   ;;  %v1589_v0 = vld [vmem:[%s2327_s1 + $0x90] ss:$8 sps:$4 sm:$0xff]   ;;  %v1591_v2 = vld [vmem:[%s2327_s1 + $0x84] ss:$8 sps:$4 sm:$0xff]  }
  0x16   :  { %930 = vmatprep.mubr.bf16.mxu1 %v1334_v55  ;;  %v1587_v63 = vld [vmem:[%s2327_s1 + $0x194] ss:$8 sps:$4 sm:$0xff]   ;;  %v1590_v1 = vld [vmem:[%s2327_s1 + $0x190] ss:$8 sps:$4 sm:$0xff]   ;;  %v1593_v3 = vld [vmem:[%s2327_s1 + $0x184] ss:$8 sps:$4 sm:$0xff]  }
  0x17   :  { %866 = vmatpush1.bf16.msra.mxu0 %v1535_v22  ;;  %v1595_v4 = vld [vmem:[%s2327_s1 + $0x80] ss:$8 sps:$4 sm:$0xff]   ;;  %v1599_v6 = vld [vmem:[%s2327_s1 + $0x274] ss:$8 sps:$4 sm:$0xff]   ;;  %v1597_v10 = vld [vmem:[%s2327_s1 + $0x270] ss:$8 sps:$4 sm:$0xff]  }
  0x18   :  { %909 = vmatpush1.bf16.msra.mxu1 %v1536_v23  ;;  %867 = vmatprep.subr.bf16.mxu0 %v1537_v24  ;;  %v1596_v5 = vld [vmem:[%s2327_s1 + $0x180] ss:$8 sps:$4 sm:$0xff]   ;;  %v1602_v7 = vld [vmem:[%s2327_s1 + $0x374] ss:$8 sps:$4 sm:$0xff]   ;;  %v1600_v11 = vld [vmem:[%s2327_s1 + $0x370] ss:$8 sps:$4 sm:$0xff]  }
  0x19   :  { %910 = vmatprep.subr.bf16.mxu1 %v1539_v25  ;;  %v1605_v12 = vld [vmem:[%s2327_s1 + $0x264] ss:$8 sps:$4 sm:$0xff]   ;;  %v1603_v14 = vld [vmem:[%s2327_s1 + $0x260] ss:$8 sps:$4 sm:$0xff]   ;;  %v1611_v16 = vld [vmem:[%s2327_s1 + $0x254] ss:$8 sps:$4 sm:$0xff]  }
  0x1a   :  { %v1608_v13 = vld [vmem:[%s2327_s1 + $0x364] ss:$8 sps:$4 sm:$0xff]   ;;  %v1606_v15 = vld [vmem:[%s2327_s1 + $0x360] ss:$8 sps:$4 sm:$0xff]   ;;  %v1614_v17 = vld [vmem:[%s2327_s1 + $0x354] ss:$8 sps:$4 sm:$0xff]  }
  0x1b   :  { %868 = vmatpush1.bf16.msra.mxu0 %v1541_v26  ;;  %v1609_v18 = vld [vmem:[%s2327_s1 + $0x250] ss:$8 sps:$4 sm:$0xff]   ;;  %v1617_v20 = vld [vmem:[%s2327_s1 + $0x244] ss:$8 sps:$4 sm:$0xff]   ;;  %v1615_v22 = vld [vmem:[%s2327_s1 + $0x240] ss:$8 sps:$4 sm:$0xff]  }
  0x1c   :  { %911 = vmatpush1.bf16.msra.mxu1 %v1542_v27  ;;  %869 = vmatprep.subr.bf16.mxu0 %v1543_v28  ;;  %v1612_v19 = vld [vmem:[%s2327_s1 + $0x350] ss:$8 sps:$4 sm:$0xff]   ;;  %v1620_v21 = vld [vmem:[%s2327_s1 + $0x344] ss:$8 sps:$4 sm:$0xff]   ;;  %v1618_v23 = vld [vmem:[%s2327_s1 + $0x340] ss:$8 sps:$4 sm:$0xff]  }
  0x1d   :  { %912 = vmatprep.subr.bf16.mxu1 %v1545_v29  ;;  %v1623_v24 = vld [vmem:[%s2327_s1 + $0x234] ss:$8 sps:$4 sm:$0xff]   ;;  %v1621_v26 = vld [vmem:[%s2327_s1 + $0x230] ss:$8 sps:$4 sm:$0xff]   ;;  %v1629_v28 = vld [vmem:[%s2327_s1 + $0x224] ss:$8 sps:$4 sm:$0xff]  }
  0x1e   :  { %v1626_v25 = vld [vmem:[%s2327_s1 + $0x334] ss:$8 sps:$4 sm:$0xff]   ;;  %v1624_v27 = vld [vmem:[%s2327_s1 + $0x330] ss:$8 sps:$4 sm:$0xff]   ;;  %v1632_v29 = vld [vmem:[%s2327_s1 + $0x324] ss:$8 sps:$4 sm:$0xff]  }
  0x1f   :  { %870 = vmatpush1.bf16.msra.mxu0 %v1547_v30  ;;  %v1627_v30 = vld [vmem:[%s2327_s1 + $0x220] ss:$8 sps:$4 sm:$0xff]   ;;  %v1645_v48 = vld [vmem:[%s2327_s1 + $0x2f0] ss:$8 sps:$4 sm:$0xff]   ;;  %v1653_v50 = vld [vmem:[%s2327_s1 + $0x2e4] ss:$8 sps:$4 sm:$0xff]  }
  0x20   :  { %913 = vmatpush1.bf16.msra.mxu1 %v1548_v31  ;;  %871 = vmatprep.subr.bf16.mxu0 %v1549_v32  ;;  %v1630_v31 = vld [vmem:[%s2327_s1 + $0x320] ss:$8 sps:$4 sm:$0xff]   ;;  %v1635_v32 = vld [vmem:[%s2327_s1 + $0x214] ss:$8 sps:$4 sm:$0xff]   ;;  %v1648_v49 = vld [vmem:[%s2327_s1 + $0x3f0] ss:$8 sps:$4 sm:$0xff]  }
  0x21   :  { %914 = vmatprep.subr.bf16.mxu1 %v1551_v33  ;;  %v1638_v33 = vld [vmem:[%s2327_s1 + $0x314] ss:$8 sps:$4 sm:$0xff]   ;;  %v1656_v51 = vld [vmem:[%s2327_s1 + $0x3e4] ss:$8 sps:$4 sm:$0xff]   ;;  %v1654_v53 = vld [vmem:[%s2327_s1 + $0x3e0] ss:$8 sps:$4 sm:$0xff]  }
  0x22   :  { %v1662_v55 = vld [vmem:[%s2327_s1 + $0x3d4] ss:$8 sps:$4 sm:$0xff]  }
  0x23   :  { %872 = vmatpush2.bf16.msra.mxu0 %v1553_v34  ;;  %v2074_v34 = vld [vmem:[%s2328_s0 + $0x10] sm:$0xff] }
  0x24   :  { %915 = vmatpush2.bf16.msra.mxu1 %v1554_v35  ;;  %873 = vmatprep.subr.bf16.mxu0 %v1555_v36  ;;  %v2079_v35 = vld [vmem:[%s2328_s0 + $0x30] sm:$0xff]  ;;  %v2084_v36 = vld [vmem:[%s2328_s0 + $0x18] sm:$0xff] }
  0x25   :  { %916 = vmatprep.subr.bf16.mxu1 %v1557_v37  ;;  %v2089_v37 = vld [vmem:[%s2328_s0 + $0x38] sm:$0xff] }
  0x27   :  { %874 = vmatpush2.bf16.msra.mxu0 %v1559_v38  ;;  %v1633_v38 = vld [vmem:[%s2327_s1 + $0x210] ss:$8 sps:$4 sm:$0xff]  }
  0x28   :  { %917 = vmatpush2.bf16.msra.mxu1 %v1560_v39  ;;  %875 = vmatprep.subr.bf16.mxu0 %v1561_v40  ;;  %v1636_v39 = vld [vmem:[%s2327_s1 + $0x310] ss:$8 sps:$4 sm:$0xff]   ;;  %v1336_v40 = vcombine.high %v2074_v34, %v2079_v35 }
  0x29   :  { %918 = vmatprep.subr.bf16.mxu1 %v1563_v41  ;;  %v1641_v41 = vld [vmem:[%s2327_s1 + $0x204] ss:$8 sps:$4 sm:$0xff]  }
  0x2b   :  { %876 = vmatpush2.bf16.msra.mxu0 %v1565_v42  ;;  %v1644_v42 = vld [vmem:[%s2327_s1 + $0x304] ss:$8 sps:$4 sm:$0xff]  }
  0x2c   :  { %919 = vmatpush2.bf16.msra.mxu1 %v1566_v43  ;;  %877 = vmatprep.subr.bf16.mxu0 %v1567_v44  ;;  %v1338_v43 = vcombine.high %v2084_v36, %v2089_v37  ;;  %v1639_v44 = vld [vmem:[%s2327_s1 + $0x200] ss:$8 sps:$4 sm:$0xff]  }
  0x2d   :  { %920 = vmatprep.subr.bf16.mxu1 %v1569_v45  ;;  %v1642_v45 = vld [vmem:[%s2327_s1 + $0x300] ss:$8 sps:$4 sm:$0xff]  }
  0x2f   :  { %878 = vmatpush2.bf16.msra.mxu0 %v1571_v46  ;;  %v1647_v46 = vld [vmem:[%s2327_s1 + $0x2f4] ss:$8 sps:$4 sm:$0xff]  }
  0x30   :  { %921 = vmatpush2.bf16.msra.mxu1 %v1572_v47  ;;  %879 = vmatprep.subr.bf16.mxu0 %v1573_v52  ;;  %v1650_v47 = vld [vmem:[%s2327_s1 + $0x3f4] ss:$8 sps:$4 sm:$0xff]   ;;  %v1651_v52 = vld [vmem:[%s2327_s1 + $0x2e0] ss:$8 sps:$4 sm:$0xff]  }
  0x31   :  { %922 = vmatprep.subr.bf16.mxu1 %v1575_v54  ;;  %v1659_v54 = vld [vmem:[%s2327_s1 + $0x2d4] ss:$8 sps:$4 sm:$0xff]  }
  0x33   :  { %880 = vmatpush2.bf16.msra.mxu0 %v1577_v56  ;;  %v1657_v56 = vld [vmem:[%s2327_s1 + $0x2d0] ss:$8 sps:$4 sm:$0xff]  }
  0x34   :  { %923 = vmatpush2.bf16.msra.mxu1 %v1578_v57  ;;  %881 = vmatprep.subr.bf16.mxu0 %v1579_v58  ;;  %v1660_v57 = vld [vmem:[%s2327_s1 + $0x3d0] ss:$8 sps:$4 sm:$0xff]   ;;  %v1665_v58 = vld [vmem:[%s2327_s1 + $0x2c4] ss:$8 sps:$4 sm:$0xff]  }
  0x35   :  { %924 = vmatprep.subr.bf16.mxu1 %v1581_v59  ;;  %v1668_v59 = vld [vmem:[%s2327_s1 + $0x3c4] ss:$8 sps:$4 sm:$0xff]  }
  0x37   :  { %882 = vmatpush2.bf16.msra.mxu0 %v1583_v60  ;;  %v1663_v60 = vld [vmem:[%s2327_s1 + $0x2c0] ss:$8 sps:$4 sm:$0xff]  }
  0x38   :  { %925 = vmatpush2.bf16.msra.mxu1 %v1584_v61  ;;  %883 = vmatprep.subr.bf16.mxu0 %v1585_v62  ;;  %v1666_v61 = vld [vmem:[%s2327_s1 + $0x3c0] ss:$8 sps:$4 sm:$0xff]   ;;  %v1671_v62 = vld [vmem:[%s2327_s1 + $0x2b4] ss:$8 sps:$4 sm:$0xff]  }
  0x39   :  { %926 = vmatprep.subr.bf16.mxu1 %v1587_v63  ;;  %v1674_v63 = vld [vmem:[%s2327_s1 + $0x3b4] ss:$8 sps:$4 sm:$0xff]  }
  0x3b   :  { %884 = vmatpush2.bf16.msra.mxu0 %v1589_v0  ;;  %v1669_v0 = vld [vmem:[%s2327_s1 + $0x2b0] ss:$8 sps:$4 sm:$0xff]  }
  0x3c   :  { %927 = vmatpush2.bf16.msra.mxu1 %v1590_v1  ;;  %885 = vmatprep.subr.bf16.mxu0 %v1591_v2  ;;  %v1672_v1 = vld [vmem:[%s2327_s1 + $0x3b0] ss:$8 sps:$4 sm:$0xff]   ;;  %v1677_v2 = vld [vmem:[%s2327_s1 + $0x2a4] ss:$8 sps:$4 sm:$0xff]  }
  0x3d   :  { %928 = vmatprep.subr.bf16.mxu1 %v1593_v3  ;;  %v1680_v3 = vld [vmem:[%s2327_s1 + $0x3a4] ss:$8 sps:$4 sm:$0xff]  }
  0x3f   :  { %886 = vmatpush2.bf16.msra.mxu0 %v1595_v4  ;;  %v1675_v4 = vld [vmem:[%s2327_s1 + $0x2a0] ss:$8 sps:$4 sm:$0xff]  }
  0x40   :  { %929 = vmatpush2.bf16.msra.mxu1 %v1596_v5  ;;  %941 = vmatprep.subr.bf16.mxu0 %v1599_v6  ;;  %v1678_v5 = vld [vmem:[%s2327_s1 + $0x3a0] ss:$8 sps:$4 sm:$0xff]   ;;  %v1683_v6 = vld [vmem:[%s2327_s1 + $0x294] ss:$8 sps:$4 sm:$0xff]  }
  0x41   :  { %984 = vmatprep.subr.bf16.mxu1 %v1602_v7  ;;  %v1686_v7 = vld [vmem:[%s2327_s1 + $0x394] ss:$8 sps:$4 sm:$0xff]  }
  0x42   :  { %888 = vmatmul.mubr.bf16.vlgmr.msra.gmra.mxu0 %v1331_v8  ;;  %v1681_v8 = vld [vmem:[%s2327_s1 + $0x290] ss:$8 sps:$4 sm:$0xff]  }
  0x43   :  { %931 = vmatmul.mubr.bf16.vlgmr.msra.gmra.mxu1 %v1333_v9  ;;  %942 = vmatpush1.bf16.msra.mxu0 %v1597_v10  ;;  %v1684_v9 = vld [vmem:[%s2327_s1 + $0x390] ss:$8 sps:$4 sm:$0xff]   ;;  %v1689_v10 = vld [vmem:[%s2327_s1 + $0x284] ss:$8 sps:$4 sm:$0xff]  }
  0x44   :  { %985 = vmatpush1.bf16.msra.mxu1 %v1600_v11  ;;  %943 = vmatprep.subr.bf16.mxu0 %v1605_v12  ;;  %v1692_v11 = vld [vmem:[%s2327_s1 + $0x384] ss:$8 sps:$4 sm:$0xff]   ;;  %v1687_v12 = vld [vmem:[%s2327_s1 + $0x280] ss:$8 sps:$4 sm:$0xff]  }
  0x45   :  { %986 = vmatprep.subr.bf16.mxu1 %v1608_v13  ;;  %973 = vmatprep.mubr.bf16.mxu0 %v1336_v40  ;;  %v1690_v13 = vld [vmem:[%s2327_s1 + $0x380] ss:$8 sps:$4 sm:$0xff]   ;;  %v1731_v40 = vld [vmem:[%s2329_s3 + $0xb4] ss:$8 sps:$4 sm:$0xff]  }
  0x46   :  { %1016 = vmatprep.mubr.bf16.mxu1 %v1338_v43  ;;  %v1732_v43 = vld [vmem:[%s2329_s3 + $0xa0] ss:$8 sps:$4 sm:$0xff]  }
  0x47   :  { %944 = vmatpush1.bf16.msra.mxu0 %v1603_v14  ;;  %v1335_v14 = vcombine.low %v2074_v34, %v2079_v35  ;;  %v1722_v34 = vld [vmem:[%s2329_s3 + $0xe4] ss:$8 sps:$4 sm:$0xff]   ;;  %v1720_v35 = vld [vmem:[%s2329_s3 + $0xe0] ss:$8 sps:$4 sm:$0xff]  }
  0x48   :  { %987 = vmatpush1.bf16.msra.mxu1 %v1606_v15  ;;  %945 = vmatprep.subr.bf16.mxu0 %v1611_v16  ;;  %v1337_v15 = vcombine.low %v2084_v36, %v2089_v37  ;;  %v1693_v16 = vld [vmem:[%s2329_s3 + $0x70] ss:$8 sps:$4 sm:$0xff]   ;;  %v1725_v36 = vld [vmem:[%s2329_s3 + $0xd4] ss:$8 sps:$4 sm:$0xff]  }
  0x49   :  { %988 = vmatprep.subr.bf16.mxu1 %v1614_v17  ;;  %v1695_v17 = vld [vmem:[%s2329_s3 + $0x74] ss:$8 sps:$4 sm:$0xff]   ;;  %v1723_v37 = vld [vmem:[%s2329_s3 + $0xd0] ss:$8 sps:$4 sm:$0xff]  }
  0x4b   :  { %946 = vmatpush1.bf16.msra.mxu0 %v1609_v18  ;;  %v1698_v18 = vld [vmem:[%s2329_s3 + $0x64] ss:$8 sps:$4 sm:$0xff]  }
  0x4c   :  { %989 = vmatpush1.bf16.msra.mxu1 %v1612_v19  ;;  %947 = vmatprep.subr.bf16.mxu0 %v1617_v20  ;;  %v1696_v19 = vld [vmem:[%s2329_s3 + $0x60] ss:$8 sps:$4 sm:$0xff]   ;;  %v1701_v20 = vld [vmem:[%s2329_s3 + $0x54] ss:$8 sps:$4 sm:$0xff]  }
  0x4d   :  { %990 = vmatprep.subr.bf16.mxu1 %v1620_v21  ;;  %v1699_v21 = vld [vmem:[%s2329_s3 + $0x50] ss:$8 sps:$4 sm:$0xff]  }
  0x4f   :  { %948 = vmatpush1.bf16.msra.mxu0 %v1615_v22  ;;  %v1704_v22 = vld [vmem:[%s2329_s3 + $0x44] ss:$8 sps:$4 sm:$0xff]  }
  0x50   :  { %991 = vmatpush1.bf16.msra.mxu1 %v1618_v23  ;;  %949 = vmatprep.subr.bf16.mxu0 %v1623_v24  ;;  %v1702_v23 = vld [vmem:[%s2329_s3 + $0x40] ss:$8 sps:$4 sm:$0xff]   ;;  %v1707_v24 = vld [vmem:[%s2329_s3 + $0x34] ss:$8 sps:$4 sm:$0xff]  }
  0x51   :  { %992 = vmatprep.subr.bf16.mxu1 %v1626_v25  ;;  %v1705_v25 = vld [vmem:[%s2329_s3 + $0x30] ss:$8 sps:$4 sm:$0xff]  }
  0x53   :  { %950 = vmatpush1.bf16.msra.mxu0 %v1621_v26  ;;  %v1710_v26 = vld [vmem:[%s2329_s3 + $0x24] ss:$8 sps:$4 sm:$0xff]  }
  0x54   :  { %993 = vmatpush1.bf16.msra.mxu1 %v1624_v27  ;;  %951 = vmatprep.subr.bf16.mxu0 %v1629_v28  ;;  %v1708_v27 = vld [vmem:[%s2329_s3 + $0x20] ss:$8 sps:$4 sm:$0xff]   ;;  %v1713_v28 = vld [vmem:[%s2329_s3 + $0x14] ss:$8 sps:$4 sm:$0xff]  }
  0x55   :  { %994 = vmatprep.subr.bf16.mxu1 %v1632_v29  ;;  %v1711_v29 = vld [vmem:[%s2329_s3 + $0x10] ss:$8 sps:$4 sm:$0xff]  }
  0x57   :  { %952 = vmatpush1.bf16.msra.mxu0 %v1627_v30  ;;  %v1716_v30 = vld [vmem:[%s2329_s3 + $0x4] ss:$8 sps:$4 sm:$0xff]  }
  0x58   :  { %995 = vmatpush1.bf16.msra.mxu1 %v1630_v31  ;;  %953 = vmatprep.subr.bf16.mxu0 %v1635_v32  ;;  %v1714_v31 = vld [vmem:[%s2329_s3] ss:$8 sps:$4 sm:$0xff]   ;;  %v1719_v32 = vld [vmem:[%s2329_s3 + $0xf4] ss:$8 sps:$4 sm:$0xff]  }
  0x59   :  { %996 = vmatprep.subr.bf16.mxu1 %v1638_v33  ;;  %v1717_v33 = vld [vmem:[%s2329_s3 + $0xf0] ss:$8 sps:$4 sm:$0xff]  }
  0x5b   :  { %954 = vmatpush1.bf16.msra.mxu0 %v1633_v38  ;;  %v1728_v38 = vld [vmem:[%s2329_s3 + $0xc4] ss:$8 sps:$4 sm:$0xff]  }
  0x5c   :  { %997 = vmatpush1.bf16.msra.mxu1 %v1636_v39  ;;  %955 = vmatprep.subr.bf16.mxu0 %v1641_v41  ;;  %v1726_v39 = vld [vmem:[%s2329_s3 + $0xc0] ss:$8 sps:$4 sm:$0xff]   ;;  %v1729_v41 = vld [vmem:[%s2329_s3 + $0xb0] ss:$8 sps:$4 sm:$0xff]  }
  0x5d   :  { %998 = vmatprep.subr.bf16.mxu1 %v1644_v42  ;;  %v1734_v42 = vld [vmem:[%s2329_s3 + $0xa4] ss:$8 sps:$4 sm:$0xff]  }
  0x5f   :  { %956 = vmatpush1.bf16.msra.mxu0 %v1639_v44  ;;  %v1737_v44 = vld [vmem:[%s2329_s3 + $0x94] ss:$8 sps:$4 sm:$0xff]  }
  0x60   :  { %999 = vmatpush1.bf16.msra.mxu1 %v1642_v45  ;;  %957 = vmatprep.subr.bf16.mxu0 %v1647_v46  ;;  %v1735_v45 = vld [vmem:[%s2329_s3 + $0x90] ss:$8 sps:$4 sm:$0xff]   ;;  %v1740_v46 = vld [vmem:[%s2329_s3 + $0x84] ss:$8 sps:$4 sm:$0xff]  }
  0x61   :  { %1000 = vmatprep.subr.bf16.mxu1 %v1650_v47  ;;  %v1738_v47 = vld [vmem:[%s2329_s3 + $0x80] ss:$8 sps:$4 sm:$0xff]  }
  0x63   :  { %958 = vmatpush2.bf16.msra.mxu0 %v1645_v48  ;;  %v165_v48 = vlaneseq }
  0x64   :  { %1001 = vmatpush2.bf16.msra.mxu1 %v1648_v49  ;;  %959 = vmatprep.subr.bf16.mxu0 %v1653_v50 }
  0x65   :  { %1002 = vmatprep.subr.bf16.mxu1 %v1656_v51  ;;  %v166_v49 = vshrl.u32 %v165_v48, 7 }
  0x67   :  { %960 = vmatpush2.bf16.msra.mxu0 %v1651_v52  ;;  %v171_v52 = vsub.s32 1, %v166_v49 }
  0x68   :  { %1003 = vmatpush2.bf16.msra.mxu1 %v1654_v53  ;;  %961 = vmatprep.subr.bf16.mxu0 %v1659_v54  ;;  %v163_v53 = vld [vmem:[%s2330_s2] sm:$0x3]  ;;  %v167_v54 = vsub.s32 0, %v166_v49 }
  0x69   :  { %1004 = vmatprep.subr.bf16.mxu1 %v1662_v55 }
  0x6b   :  { %962 = vmatpush2.bf16.msra.mxu0 %v1657_v56 }
  0x6c   :  { %1005 = vmatpush2.bf16.msra.mxu1 %v1660_v57  ;;  %963 = vmatprep.subr.bf16.mxu0 %v1665_v58  ;;  %v172_v57 = vrot.slane %v163_v53, %v171_v52  ;;  %v168_v58 = vrot.slane %v163_v53, %v167_v54 }
  0x6d   :  { %1006 = vmatprep.subr.bf16.mxu1 %v1668_v59 }
  0x6f   :  { %964 = vmatpush2.bf16.msra.mxu0 %v1663_v60 }
  0x70   :  { %1007 = vmatpush2.bf16.msra.mxu1 %v1666_v61  ;;  %965 = vmatprep.subr.bf16.mxu0 %v1671_v62 }
  0x71   :  { %1008 = vmatprep.subr.bf16.mxu1 %v1674_v63 }
  0x73   :  { %966 = vmatpush2.bf16.msra.mxu0 %v1669_v0 }
  0x74   :  { %1009 = vmatpush2.bf16.msra.mxu1 %v1672_v1  ;;  %967 = vmatprep.subr.bf16.mxu0 %v1677_v2 }
  0x75   :  { %1010 = vmatprep.subr.bf16.mxu1 %v1680_v3 }
  0x77   :  { %968 = vmatpush2.bf16.msra.mxu0 %v1675_v4 }
  0x78   :  { %1011 = vmatpush2.bf16.msra.mxu1 %v1678_v5  ;;  %969 = vmatprep.subr.bf16.mxu0 %v1683_v6 }
  0x79   :  { %1012 = vmatprep.subr.bf16.mxu1 %v1686_v7 }
  0x7b   :  { %970 = vmatpush2.bf16.msra.mxu0 %v1681_v8 }
  0x7c   :  { %1013 = vmatpush2.bf16.msra.mxu1 %v1684_v9  ;;  %971 = vmatprep.subr.bf16.mxu0 %v1689_v10 }
  0x7d   :  { %1014 = vmatprep.subr.bf16.mxu1 %v1692_v11 }
  0x7f   :  { %972 = vmatpush2.bf16.msra.mxu0 %v1687_v12 }
  0x80   :  { %1015 = vmatpush2.bf16.msra.mxu1 %v1690_v13  ;;  %1237 = vmatprep.subr.bf16.mxu0 %v1695_v17 }
  0x82   :  { %974 = vmatmul.mubr.bf16.vlgmr.msra.gmra.mxu0 %v1335_v14 }
  0x83   :  { %1017 = vmatmul.mubr.bf16.vlgmr.msra.gmra.mxu1 %v1337_v15  ;;  %1238 = vmatpush1.bf16.msra.mxu0 %v1693_v16 }
  0x84   :  { %1239 = vmatprep.subr.bf16.mxu0 %v1698_v18 }
  0x87   :  { %1240 = vmatpush1.bf16.msra.mxu0 %v1696_v19 }
  0x88   :  { %1241 = vmatprep.subr.bf16.mxu0 %v1701_v20 }
  0x8b   :  { %1242 = vmatpush1.bf16.msra.mxu0 %v1699_v21 }
  0x8c   :  { %1243 = vmatprep.subr.bf16.mxu0 %v1704_v22 }
  0x8f   :  { %1244 = vmatpush1.bf16.msra.mxu0 %v1702_v23 }
  0x90   :  { %1245 = vmatprep.subr.bf16.mxu0 %v1707_v24 }
  0x93   :  { %1246 = vmatpush1.bf16.msra.mxu0 %v1705_v25 }
  0x94   :  { %1247 = vmatprep.subr.bf16.mxu0 %v1710_v26 }
  0x97   :  { %1248 = vmatpush1.bf16.msra.mxu0 %v1708_v27 }
  0x98   :  { %1249 = vmatprep.subr.bf16.mxu0 %v1713_v28 }
  0x9b   :  { %1250 = vmatpush1.bf16.msra.mxu0 %v1711_v29  ;;  %v1065_v29 = vld [vmem:[%s2331_s4] sm:$0x3] }
  0x9c   :  { %1251 = vmatprep.subr.bf16.mxu0 %v1716_v30  ;;  %v1070_v30 = vrot.slane %v1065_v29, %v167_v54 }
  0x9f   :  { %1252 = vmatpush1.bf16.msra.mxu0 %v1714_v31  ;;  %v1074_v31 = vrot.slane %v1065_v29, %v171_v52 }
  0xa0   :  { %1253 = vmatprep.subr.bf16.mxu0 %v1719_v32 }
  0xa3   :  { %1254 = vmatpush2.bf16.msra.mxu0 %v1717_v33  ;;  %v1284_v33 = vld [vmem:[%s2332_s5] sm:$0x3] }
  0xa4   :  { %1255 = vmatprep.subr.bf16.mxu0 %v1722_v34 }
  0xa7   :  { %1256 = vmatpush2.bf16.msra.mxu0 %v1720_v35 }
  0xa8   :  { %1257 = vmatprep.subr.bf16.mxu0 %v1725_v36 }
  0xab   :  { %1258 = vmatpush2.bf16.msra.mxu0 %v1723_v37 }
  0xac   :  { %1259 = vmatprep.subr.bf16.mxu0 %v1728_v38  ;;  %v1289_v38 = vrot.slane %v1284_v33, %v167_v54  ;;  %v1307_v54 = vstv %s2333_s6 }
  0xaf   :  { %1260 = vmatpush2.bf16.msra.mxu0 %v1726_v39  ;;  %v1293_v39 = vrot.slane %v1284_v33, %v171_v52 }
  0xb0   :  { %1261 = vmatprep.subr.bf16.mxu0 %v1731_v40 }
  0xb3   :  { %1262 = vmatpush2.bf16.msra.mxu0 %v1729_v41 }
  0xb4   :  { %1263 = vmatprep.subr.bf16.mxu0 %v1734_v42 }
  0xb7   :  { %1264 = vmatpush2.bf16.msra.mxu0 %v1732_v43 }
  0xb8   :  { %1265 = vmatprep.subr.bf16.mxu0 %v1737_v44 }
  0xbb   :  { %1266 = vmatpush2.bf16.msra.mxu0 %v1735_v45 }
  0xbc   :  { %1267 = vmatprep.subr.bf16.mxu0 %v1740_v46 }
  0xbf   :  { %1268 = vmatpush2.bf16.msra.mxu0 %v1738_v47 }
 0x102   :  { %v889_v50 = vpop.f32.mrf.mxu0 }
 0x103   :  { %v932_v51 = vpop.f32.mrf.mxu1  ;;  %v890_v62 = vadd.f32 %v889_v50, %v168_v58 }
 0x104   :  { %v891_v55 = vpop.f32.mrf.mxu0 }
 0x105   :  { %v934_v56 = vpop.f32.mrf.mxu1  ;;  %v892_v61 = vadd.f32 %v891_v55, %v172_v57  ;;  %v933_v6 = vadd.f32 %v932_v51, %v890_v62 }
 0x106   :  { %v893_v59 = vpop.f32.mrf.mxu0 }
 0x107   :  { %v936_v60 = vpop.f32.mrf.mxu1  ;;  %v894_v1 = vadd.f32 %v893_v59, %v168_v58  ;;  %v935_v4 = vadd.f32 %v934_v56, %v892_v61 }
 0x108   :  { %v895_v63 = vpop.f32.mrf.mxu0 }
 0x109   :  { %v938_v0 = vpop.f32.mrf.mxu1  ;;  %v896_v5 = vadd.f32 %v895_v63, %v172_v57  ;;  %v937_v9 = vadd.f32 %v936_v60, %v894_v1 }
 0x10b   :  { %v939_v14 = vadd.f32 %v938_v0, %v896_v5 }
 0x142   :  { %v975_v2 = vpop.f32.mrf.mxu0 }
 0x143   :  { %v1018_v3 = vpop.f32.mrf.mxu1  ;;  %v976_v11 = vadd.f32 %v975_v2, %v933_v6 }
 0x144   :  { %v977_v7 = vpop.f32.mrf.mxu0 }
 0x145   :  { %v1020_v8 = vpop.f32.mrf.mxu1  ;;  %v978_v10 = vadd.f32 %v977_v7, %v935_v4  ;;  %v1019_v20 = vadd.f32 %v1018_v3, %v976_v11 }
 0x146   :  { %v979_v12 = vpop.f32.mrf.mxu0 }
 0x147   :  { %v1022_v13 = vpop.f32.mrf.mxu1  ;;  %v980_v15 = vadd.f32 %v979_v12, %v937_v9  ;;  %v1021_v17 = vadd.f32 %v1020_v8, %v978_v10  ;;  %v1027_v26 = vmax.f32 %v1019_v20, 0.0 }
 0x148   :  { %v981_v16 = vpop.f32.mrf.mxu0 }
 0x149   :  { %v1023_v18 = vadd.f32 %v1022_v13, %v980_v15  ;;  %v982_v19 = vadd.f32 %v981_v16, %v939_v14  ;;  %v1024_v21 = vpop.f32.mrf.mxu1  ;;  %v1028_v24 = vmax.f32 %v1021_v17, 0.0 }
 0x14b   :  { %v1025_v22 = vadd.f32 %v1024_v21, %v982_v19  ;;  %v1029_v23 = vmax.f32 %v1023_v18, 0.0 }
 0x14d   :  { %v1030_v25 = vmax.f32 %v1025_v22, 0.0  ;;  %v1031_v28 = vpack.c.bf16 %v1029_v23, %v1027_v26 }
 0x14f   :  { %v1032_v27 = vpack.c.bf16 %v1030_v25, %v1028_v24 }
 0x151   :  { %1269 = vmatprep.mubr.bf16.mxu0 %v1032_v27 }
 0x152   :  { %1270 = vmatmul.mubr.bf16.vlgmr.msra.gmra.mxu0 %v1031_v28 }
 0x212   :  { %v1271_v32 = vpop.f32.mrf.mxu0 }
 0x213   :  { %v1272_v34 = vadd.f32 %v1271_v32, %v1070_v30 }
 0x214   :  { %v1273_v35 = vpop.f32.mrf.mxu0 }
 0x215   :  { %v1280_v36 = vmax.f32 %v1272_v34, 0.0  ;;  %v1274_v37 = vadd.f32 %v1273_v35, %v1074_v31 }
 0x216   :  { %v1275_v40 = vpop.f32.mrf.mxu0 }
 0x217   :  { %v1281_v41 = vmax.f32 %v1274_v37, 0.0  ;;  %v1276_v42 = vadd.f32 %v1275_v40, %v1070_v30  ;;  %v1296_v46 = vmul.f32 %v1289_v38, %v1280_v36 }
 0x218   :  { %v1277_v43 = vpop.f32.mrf.mxu0 }
 0x219   :  { %v1282_v44 = vmax.f32 %v1276_v42, 0.0  ;;  %v1278_v45 = vadd.f32 %v1277_v43, %v1074_v31  ;;  %v1297_v47 = vmul.f32 %v1293_v39, %v1281_v41 }
 0x21b   :  { %v1283_v48 = vmax.f32 %v1278_v45, 0.0  ;;  %v1300_v49 = vadd.f32 %v1297_v47, %v1296_v46  ;;  %v1298_v50 = vmul.f32 %v1289_v38, %v1282_v44 }
 0x21d   :  { %v1299_v51 = vmul.f32 %v1293_v39, %v1283_v48  ;;  %1301 = vadd.xlane.f32.xlu0 %v1300_v49 }
 0x21f   :  { %v1303_v53 = vadd.f32 %v1299_v51, %v1298_v50 }
 0x221   :  { %1304 = vadd.xlane.f32.xlu0 %v1303_v53 }
 0x2a6   :  { %v1302_v52 = vpop.xlane.xlu0 %1301 }
 0x2a7   :  { %v1308_v55 = vadd.f32 %v1307_v54, %v1302_v52 }
 0x2a9   :  { %v1499_v56 = vclamps-f32 %v1308_v55, 30.0 }
 0x2aa   :  { %v1305_v57 = vpop.xlane.xlu0 %1304 }
 0x2ab   :  { %v1314_v58 = vsub.f32 0.0, %v1499_v56  ;;  %v1309_v59 = vadd.f32 %v1307_v54, %v1305_v57 }
 0x2ad   :  { %v1316_v60 = vmul.f32 1.442695, %v1314_v58  ;;  %v1500_v61 = vclamps-f32 %v1309_v59, 30.0 }
 0x2af   :  { %1741 = vpow2.f32 %v1316_v60  ;;  %v1315_v62 = vsub.f32 0.0, %v1500_v61 }
 0x2b1   :  { %v1318_v63 = vmul.f32 1.442695, %v1315_v62 }
 0x2b3   :  { %1743 = vpow2.f32 %v1318_v63 }
 0x2bc   :  { %v1742_v0 = vpop.eup %1741 }
 0x2bd   :  { %v1320_v1 = vadd.f32 1.0, %v1742_v0 }
 0x2bf   :  { %1745 = vrcp.f32 %v1320_v1 }
 0x2c0   :  { %v1744_v2 = vpop.eup %1743 }
 0x2c1   :  { %v1321_v3 = vadd.f32 1.0, %v1744_v2 }
 0x2c3   :  { %1747 = vrcp.f32 %v1321_v3 }
 0x2cc   :  { %v1746_v4 = vpop.eup %1745 }
 0x2cd   :  { %1325 = vst.msk [vmem:[%s2334_s7] sm:$0xff] %vm1324_vm0, %v1746_v4 }
 0x2d0   :  { %v1748_v5 = vpop.eup %1747 }
 0x2d1   :  { %1326 = vst.msk [vmem:[%s2334_s7 + $0x8] sm:$0xff] %vm1324_vm0, %v1748_v5 }

</bundles_post_ra>
